<compile_context>
chip_gen: v6e
topology: v6e:2x2x1
jax: 0.10.0
libtpu: 0.0.40
codegen_flags: <defaults>
</compile_context>

<pallas_src>
import math

import jax
import jax.numpy as jnp
from jax.experimental import pallas as pl
from jax.experimental.pallas import tpu as pltpu


def _gelu_tanh(x):
    # GPT-BigCode default activation: "gelu_pytorch_tanh"
    c = math.sqrt(2.0 / math.pi)
    return 0.5 * x * (1.0 + jnp.tanh(c * (x + 0.044715 * x * x * x)))


# ---------------------------------------------------------------------------
# Kernels
# ---------------------------------------------------------------------------

def _mlp_kernel_scratch(x_ref, w_fc_ref, b_fc_ref, w_proj_ref, b_proj_ref,
                        o_ref, acc_ref):
    """Variant for narrow output dtypes: accumulate in an f32 VMEM scratch."""
    ii = pl.program_id(1)  # intermediate-dim (reduction) axis

    @pl.when(ii == 0)
    def _init():
        # Fold the c_proj bias into the accumulator init.
        acc_ref[...] = jnp.broadcast_to(b_proj_ref[...], acc_ref.shape)

    # c_fc partial: [tm, H] @ [H, ti] on the MXU (f32 accumulate)
    h = jnp.dot(x_ref[...], w_fc_ref[...], preferred_element_type=jnp.float32)
    # bias + tanh-GELU in f32 (VPU/EUP)
    h = _gelu_tanh(h + b_fc_ref[...])
    # c_proj partial: [tm, ti] @ [ti, H], accumulate in f32
    acc_ref[...] += jnp.dot(h.astype(w_proj_ref.dtype), w_proj_ref[...],
                            preferred_element_type=jnp.float32)

    @pl.when(ii == pl.num_programs(1) - 1)
    def _writeback():
        o_ref[...] = acc_ref[...].astype(o_ref.dtype)


def _mlp_kernel_inplace(x_ref, w_fc_ref, b_fc_ref, w_proj_ref, b_proj_ref, o_ref):
    """Variant for f32 outputs: the output block is resident across the reduction
    axis, so accumulate directly into o_ref (saves tm*Hp*4 bytes of VMEM)."""
    ii = pl.program_id(1)

    @pl.when(ii == 0)
    def _init():
        o_ref[...] = jnp.broadcast_to(b_proj_ref[...], o_ref.shape)

    h = jnp.dot(x_ref[...], w_fc_ref[...], preferred_element_type=jnp.float32)
    h = _gelu_tanh(h + b_fc_ref[...])
    o_ref[...] += jnp.dot(h.astype(w_proj_ref.dtype), w_proj_ref[...],
                          preferred_element_type=jnp.float32)


# ---------------------------------------------------------------------------
# Helpers
# ---------------------------------------------------------------------------

def _round_up(n, m):
    return ((n + m - 1) // m) * m


def _pad_axis_to(a, axis, target):
    pad = target - a.shape[axis]
    if pad <= 0:
        return a
    widths = [(0, 0)] * a.ndim
    widths[axis] = (0, pad)
    return jnp.pad(a, widths)


def _detect_vmem_capacity_bytes():
    try:
        return int(pltpu.get_tpu_info().vmem_capacity_bytes)
    except Exception:
        return None


def _default_tiles(S, Ip, vmem_cap):
    """Pick (tm, ti).  tm must exceed peak_flops/hbm_bw to be MXU-bound
    (~240 on v5e, ~680 on v6e, ~310 on v7x); VMEM caps how big we can go."""
    if vmem_cap is not None and vmem_cap <= (80 << 20):
        # v7x-like: 64 MiB/TC. Narrow ti (matches 256-wide MXU), tm=512,
        # and keep >=2 S tiles so both TensorCores have work.
        tm_t, ti_t, prefer_two_s_tiles = 512, 256, True
    else:
        # v5e / v6e: 128 MiB VMEM.  tm=768 clears the v6e roofline break-even.
        tm_t, ti_t, prefer_two_s_tiles = 768, 512, False

    if S <= tm_t:
        tm = _round_up(S, 8)
    else:
        tm = tm_t
        if prefer_two_s_tiles:
            tm = min(tm, _round_up(-(-S // 2), 8))  # keep grid[0] >= 2

    # ti: largest multiple of 128 <= target that divides Ip (Ip is a multiple
    # of 128, so ti=128 always works) -> no ragged reduction tiles.
    ti = max(128, min(ti_t, Ip) - (min(ti_t, Ip) % 128))
    while Ip % ti != 0:
        ti -= 128
    return tm, ti


def _vmem_estimate_bytes(tm, ti, Hp, compute_dtype, out_dtype, use_scratch, x_bufs):
    cb = jnp.dtype(compute_dtype).itemsize
    ob = jnp.dtype(out_dtype).itemsize
    return (tm * Hp * cb * x_bufs          # x tile
            + Hp * ti * cb * 2             # c_fc weight tile (double-buffered)
            + ti * Hp * cb * 2             # c_proj weight tile (double-buffered)
            + (ti + Hp) * 4 * 2            # biases (f32, tiny)
            + tm * Hp * ob * 2             # output tile (double-buffered)
            + (tm * Hp * 4 if use_scratch else 0))  # f32 accumulator scratch


# ---------------------------------------------------------------------------
# Public API
# ---------------------------------------------------------------------------

def prepare_gpt_big_mlp_params(w_fc, b_fc, w_proj, b_proj,
                               compute_dtype=jnp.bfloat16):
    """One-time weight prep (do at model-load time, NOT per forward):
      * pad H and I up to multiples of 128 (lane alignment; zero padding is
        numerically inert through the whole MLP),
      * cast the MXU operands to compute_dtype ONCE (avoids ~0.9 GB of per-call
        HBM traffic at real GPT-BigCode scale from an in-call f32->bf16 cast).
    w_fc: [H, I], w_proj: [I, H], biases [I] / [H] (or [1, I] / [1, H])."""
    H, I = w_fc.shape
    Hp, Ip = _round_up(H, 128), _round_up(I, 128)

    b_fc = jnp.reshape(b_fc, (1, I)).astype(jnp.float32)
    b_proj = jnp.reshape(b_proj, (1, H)).astype(jnp.float32)

    return dict(
        w_fc=_pad_axis_to(_pad_axis_to(w_fc, 0, Hp), 1, Ip).astype(compute_dtype),
        w_proj=_pad_axis_to(_pad_axis_to(w_proj, 0, Ip), 1, Hp).astype(compute_dtype),
        b_fc=_pad_axis_to(b_fc, 1, Ip),
        b_proj=_pad_axis_to(b_proj, 1, Hp),
        hidden=H,
        intermediate=I,
        compute_dtype=jnp.dtype(compute_dtype),
    )


def gpt_big_mlp(x, params, *, tm=None, ti=None, out_dtype=None,
                vmem_limit_bytes=None, single_buffer_x=False):
    """Forward: gelu_tanh(x @ w_fc + b_fc) @ w_proj + b_proj.  x: [S, H]."""
    H = params["hidden"]
    w_fc, b_fc = params["w_fc"], params["b_fc"]
    w_proj, b_proj = params["w_proj"], params["b_proj"]
    compute_dtype = params["compute_dtype"]

    S = x.shape[0]
    Hp, Ip = w_fc.shape
    out_dtype = jnp.dtype(x.dtype if out_dtype is None else out_dtype)

    vmem_cap = _detect_vmem_capacity_bytes()
    d_tm, d_ti = _default_tiles(S, Ip, vmem_cap)
    tm = d_tm if tm is None else tm
    ti = d_ti if ti is None else ti

    # Pad activations per call: rows to a multiple of tm (dense stores, full
    # MXU M on every tile), columns to Hp.  Zero padding is inert.
    Sp = _round_up(S, tm)
    x_p = _pad_axis_to(_pad_axis_to(x, 1, Hp), 0, Sp).astype(compute_dtype)

    grid = (Sp // tm, Ip // ti)

    # f32 outputs accumulate directly into the resident output block; narrow
    # outputs keep an f32 VMEM scratch accumulator.
    use_scratch = out_dtype != jnp.dtype(jnp.float32)
    kernel = _mlp_kernel_scratch if use_scratch else _mlp_kernel_inplace
    scratch = [pltpu.VMEM((tm, Hp), jnp.float32)] if use_scratch else []

    if vmem_limit_bytes is None:
        need = _vmem_estimate_bytes(tm, ti, Hp, compute_dtype, out_dtype,
                                    use_scratch,
                                    x_bufs=1 if single_buffer_x else 2)
        vmem_limit_bytes = int(need * 1.25) + (4 << 20)   # headroom for internal scratch
        vmem_limit_bytes = max(vmem_limit_bytes, 32 << 20)
        vmem_limit_bytes = min(vmem_limit_bytes,
                               vmem_cap if vmem_cap is not None else (128 << 20))

    # x is invariant over the reduction axis (re-DMA'd once per S tile), so
    # single-buffering it frees tm*Hp*itemsize bytes — worth it on v7x.
    x_spec_kwargs = {}
    if single_buffer_x:
        x_spec_kwargs["pipeline_mode"] = pl.Buffered(1)
    x_spec = pl.BlockSpec((tm, Hp), lambda i, j: (i, 0), **x_spec_kwargs)

    out_p = pl.pallas_call(
        kernel,
        out_shape=jax.ShapeDtypeStruct((Sp, Hp), out_dtype),
        grid_spec=pltpu.PrefetchScalarGridSpec(
            num_scalar_prefetch=0,
            grid=grid,
            in_specs=[
                x_spec,                                         # x tile (invariant over j)
                pl.BlockSpec((Hp, ti), lambda i, j: (0, j)),    # c_fc weight tile
                pl.BlockSpec((1, ti), lambda i, j: (0, j)),     # c_fc bias tile
                pl.BlockSpec((ti, Hp), lambda i, j: (j, 0)),    # c_proj weight tile
                pl.BlockSpec((1, Hp), lambda i, j: (0, 0)),     # c_proj bias (invariant)
            ],
            out_specs=pl.BlockSpec((tm, Hp), lambda i, j: (i, 0)),
            scratch_shapes=scratch,
        ),
        compiler_params=pltpu.CompilerParams(
            dimension_semantics=("parallel", "arbitrary"),
            vmem_limit_bytes=vmem_limit_bytes,
        ),
    )(x_p, w_fc, b_fc, w_proj, b_proj)

    return out_p[:S, :H]


# ---------------------------------------------------------------------------
# Reference + self-test
# ---------------------------------------------------------------------------

def _reference(x, w_fc, b_fc, w_proj, b_proj):
    h = (x.astype(jnp.float32) @ w_fc.astype(jnp.float32)
         + jnp.reshape(b_fc, (1, -1)).astype(jnp.float32))
    h = _gelu_tanh(h)
    o = (h @ w_proj.astype(jnp.float32)
         + jnp.reshape(b_proj, (1, -1)).astype(jnp.float32))
    return o.astype(x.dtype)


if __name__ == "__main__":
    # Small shapes consistent with the module: seq=8, hidden=32, intermediate=4*hidden
    S, H = 8, 32
    INTERMEDIATE = 4 * H  # 128

    key = jax.random.PRNGKey(0)
    k_x, k_wfc, k_bfc, k_wpj, k_bpj = jax.random.split(key, 5)

    x = jax.random.normal(k_x, (S, H), dtype=jnp.float32)
    w_fc = jax.random.normal(k_wfc, (H, INTERMEDIATE), dtype=jnp.float32) * 0.02
    b_fc = jax.random.normal(k_bfc, (INTERMEDIATE,), dtype=jnp.float32) * 0.02
    w_proj = jax.random.normal(k_wpj, (INTERMEDIATE, H), dtype=jnp.float32) * 0.02
    b_proj = jax.random.normal(k_bpj, (H,), dtype=jnp.float32) * 0.02

    ref = _reference(x, w_fc, b_fc, w_proj, b_proj)

    # One-time weight prep (padding + compute-dtype cast hoisted out of forward).
    params_f32 = prepare_gpt_big_mlp_params(w_fc, b_fc, w_proj, b_proj, jnp.float32)
    params_bf16 = prepare_gpt_big_mlp_params(w_fc, b_fc, w_proj, b_proj, jnp.bfloat16)

    # 1) f32 compute, f32 output -> in-place accumulator path, tight tolerance.
    out_f32 = jax.block_until_ready(gpt_big_mlp(x, params_f32))
    assert out_f32.shape == (S, H)
    assert jnp.allclose(out_f32, ref, atol=1e-4, rtol=1e-4), "f32 path mismatch"

    # 2) bf16 compute, f32 output -> in-place accumulator path, loose tolerance.
    out_bf16 = jax.block_until_ready(gpt_big_mlp(x, params_bf16))
    assert out_bf16.shape == (S, H)
    assert jnp.allclose(out_bf16, ref, atol=1e-2, rtol=1e-2), "bf16 path mismatch"

    # 3) bf16 compute, bf16 output -> scratch accumulator path.
    out_bf16o = jax.block_until_ready(
        gpt_big_mlp(x, params_bf16, out_dtype=jnp.bfloat16))
    assert out_bf16o.shape == (S, H)
    assert jnp.allclose(out_bf16o.astype(jnp.float32), ref, atol=2e-2, rtol=2e-2), \
        "bf16-out path mismatch"

    print("KERNEL_OK")
</pallas_src>

<mosaic_0001>
module attributes {stable_mosaic.version = 11 : i64} {
  func.func @_mlp_kernel_inplace(%arg0: i32, %arg1: i32, %arg2: memref<8x128xf32, #tpu.memory_space<vmem>>, %arg3: memref<128x128xf32, #tpu.memory_space<vmem>>, %arg4: memref<1x128xf32, #tpu.memory_space<vmem>>, %arg5: memref<128x128xf32, #tpu.memory_space<vmem>>, %arg6: memref<1x128xf32, #tpu.memory_space<vmem>>, %arg7: memref<8x128xf32, #tpu.memory_space<vmem>>) attributes {dimension_semantics = [#tpu.dimension_semantics<parallel>, #tpu.dimension_semantics<arbitrary>], iteration_bounds = array<i64: 1, 1>, scalar_prefetch = 0 : i64, scratch_operands = 0 : i64, tpu.core_type = #tpu.core_type<tc>, window_params = [{transform_indices = @transform_0, window_bounds = array<i64: 8, 128>}, {transform_indices = @transform_1, window_bounds = array<i64: 128, 128>}, {transform_indices = @transform_2, window_bounds = array<i64: 1, 128>}, {transform_indices = @transform_3, window_bounds = array<i64: 128, 128>}, {pipeline_mode = #tpu.pipeline_mode<synchronous>, transform_indices = @transform_4, window_bounds = array<i64: 1, 128>}, {transform_indices = @transform_5, window_bounds = array<i64: 8, 128>}]} {
    %c0_i32 = arith.constant 0 : i32
    %0 = arith.cmpi eq, %arg1, %c0_i32 : i32
    %1 = arith.extui %0 : i1 to i32
    %c0_i32_0 = arith.constant 0 : i32
    %2 = arith.cmpi ne, %1, %c0_i32_0 : i32
    scf.if %2 {
      %c0_17 = arith.constant 0 : index
      %c0_18 = arith.constant 0 : index
      %27 = vector.load %arg6[%c0_17, %c0_18] : memref<1x128xf32, #tpu.memory_space<vmem>>, vector<1x128xf32>
      %28 = vector.shape_cast %27 : vector<1x128xf32> to vector<1x128xf32>
      %29 = vector.broadcast %28 : vector<1x128xf32> to vector<8x128xf32>
      %c0_19 = arith.constant 0 : index
      %c0_20 = arith.constant 0 : index
      %30 = vector.load %arg7[%c0_19, %c0_20] : memref<8x128xf32, #tpu.memory_space<vmem>>, vector<8x128xf32>
      tpu.vector_store %arg7[%c0_19, %c0_20], %29 {strides = array<i32>} : memref<8x128xf32, #tpu.memory_space<vmem>>, vector<8x128xf32>,
    } else {
    }
    %c0 = arith.constant 0 : index
    %c0_1 = arith.constant 0 : index
    %3 = vector.load %arg2[%c0, %c0_1] : memref<8x128xf32, #tpu.memory_space<vmem>>, vector<8x128xf32>
    %c0_2 = arith.constant 0 : index
    %c0_3 = arith.constant 0 : index
    %4 = vector.load %arg3[%c0_2, %c0_3] : memref<128x128xf32, #tpu.memory_space<vmem>>, vector<128x128xf32>
    %cst = arith.constant dense<0.000000e+00> : vector<8x128xf32>
    %5 = tpu.matmul %3, %4, %cst {dimension_numbers = #tpu.dot_dimension_numbers<[1], [0], [0], [1], [0, 0, 1, 1], [], []>} : vector<8x128xf32>, vector<128x128xf32>, vector<8x128xf32> -> vector<8x128xf32>
    %c0_4 = arith.constant 0 : index
    %c0_5 = arith.constant 0 : index
    %6 = vector.load %arg4[%c0_4, %c0_5] : memref<1x128xf32, #tpu.memory_space<vmem>>, vector<1x128xf32>
    %7 = vector.broadcast %6 : vector<1x128xf32> to vector<8x128xf32>
    %8 = arith.addf %5, %7 : vector<8x128xf32>
    %cst_6 = arith.constant 5.000000e-01 : f32
    %9 = vector.broadcast %cst_6 : f32 to vector<8x128xf32>
    %10 = arith.mulf %9, %8 : vector<8x128xf32>
    %cst_7 = arith.constant 4.471500e-02 : f32
    %11 = vector.broadcast %cst_7 : f32 to vector<8x128xf32>
    %12 = arith.mulf %11, %8 : vector<8x128xf32>
    %13 = arith.mulf %12, %8 : vector<8x128xf32>
    %14 = arith.mulf %13, %8 : vector<8x128xf32>
    %15 = arith.addf %8, %14 : vector<8x128xf32>
    %cst_8 = arith.constant 0.797884583 : f32
    %16 = vector.broadcast %cst_8 : f32 to vector<8x128xf32>
    %17 = arith.mulf %16, %15 : vector<8x128xf32>
    %18 = math.tanh %17 : vector<8x128xf32>
    %cst_9 = arith.constant 1.000000e+00 : f32
    %19 = vector.broadcast %cst_9 : f32 to vector<8x128xf32>
    %20 = arith.addf %19, %18 : vector<8x128xf32>
    %21 = arith.mulf %10, %20 : vector<8x128xf32>
    %c0_10 = arith.constant 0 : index
    %c0_11 = arith.constant 0 : index
    %22 = vector.load %arg7[%c0_10, %c0_11] : memref<8x128xf32, #tpu.memory_space<vmem>>, vector<8x128xf32>
    %c0_12 = arith.constant 0 : index
    %c0_13 = arith.constant 0 : index
    %23 = vector.load %arg5[%c0_12, %c0_13] : memref<128x128xf32, #tpu.memory_space<vmem>>, vector<128x128xf32>
    %cst_14 = arith.constant dense<0.000000e+00> : vector<8x128xf32>
    %24 = tpu.matmul %21, %23, %cst_14 {dimension_numbers = #tpu.dot_dimension_numbers<[1], [0], [0], [1], [0, 0, 1, 1], [], []>} : vector<8x128xf32>, vector<128x128xf32>, vector<8x128xf32> -> vector<8x128xf32>
    %25 = arith.addf %22, %24 : vector<8x128xf32>
    %c0_15 = arith.constant 0 : index
    %c0_16 = arith.constant 0 : index
    %26 = vector.load %arg7[%c0_15, %c0_16] : memref<8x128xf32, #tpu.memory_space<vmem>>, vector<8x128xf32>
    tpu.vector_store %arg7[%c0_15, %c0_16], %25 {strides = array<i32>} : memref<8x128xf32, #tpu.memory_space<vmem>>, vector<8x128xf32>,
    return
  }
  func.func @transform_0(%arg0: i32, %arg1: i32) -> (i32, i32) {
    %c0_i32 = arith.constant 0 : i32
    %c0_i32_0 = arith.constant 0 : i32
    return %arg0, %c0_i32 : i32, i32
  }
  func.func @transform_1(%arg0: i32, %arg1: i32) -> (i32, i32) {
    %c0_i32 = arith.constant 0 : i32
    %c0_i32_0 = arith.constant 0 : i32
    return %c0_i32, %arg1 : i32, i32
  }
  func.func @transform_2(%arg0: i32, %arg1: i32) -> (i32, i32) {
    %c0_i32 = arith.constant 0 : i32
    %c0_i32_0 = arith.constant 0 : i32
    return %c0_i32, %arg1 : i32, i32
  }
  func.func @transform_3(%arg0: i32, %arg1: i32) -> (i32, i32) {
    %c0_i32 = arith.constant 0 : i32
    %c0_i32_0 = arith.constant 0 : i32
    return %arg1, %c0_i32 : i32, i32
  }
  func.func @transform_4(%arg0: i32, %arg1: i32) -> (i32, i32) {
    %c0_i32 = arith.constant 0 : i32
    %c0_i32_0 = arith.constant 0 : i32
    %c0_i32_1 = arith.constant 0 : i32
    return %c0_i32, %c0_i32_0 : i32, i32
  }
  func.func @transform_5(%arg0: i32, %arg1: i32) -> (i32, i32) {
    %c0_i32 = arith.constant 0 : i32
    %c0_i32_0 = arith.constant 0 : i32
    return %arg0, %c0_i32 : i32, i32
  }
}

</mosaic_0001>

<bundles_post_ra>
// kernel: tpu_custom_call.1
= control target key start
LH: loop header
LB: loop body
LE: loop exit
PB: predicated region body
PF: predicated region fallthrough
CT: control target
= control target key end

     0   :  { %10 = vsyncpa [#allocation3], 0  ;;  %s572_s0 = inlined_call_operand.hbm [shape: f32[8,128], index: 0, kind: input, shape index: {}]   ;;  %s573_s1 = inlined_call_operand.hbm [shape: f32[128,128], index: 1, kind: input, shape index: {}]   ;;  %s574_s2 = inlined_call_operand.vmem [shape: f32[1,128], index: 2, kind: input, shape index: {}]   ;;  %s575_s3 = inlined_call_operand.hbm [shape: f32[128,128], index: 3, kind: input, shape index: {}]   ;;  %s576_s4 = inlined_call_operand.vmem [shape: f32[1,128], index: 4, kind: input, shape index: {}]   ;;  %s577_s5 = inlined_call_operand.hbm [shape: f32[8,128], index: 5, kind: output, shape index: {}]  }
   0x1   :  { %11 = vsyncpa [#allocation6], 0 }
   0x2   :  { %12 = vsyncpa [#allocation4], 0  ;;  %s482_s18 = smov [#allocation5]  }
   0x3   :  { %s28_s19 = sshll.u32 %s482_s18, 4  ;;  %s29_s19 = int_to_ptr.vmem [resolvable:$true] %s28_s19 }
   0x4   :  { %s404_s20 = scalar_lea.vmem %s29_s19, 2048  ;;  %p409_p1 = scmp.lt.s32.totalorder %s29_s19, %s29_s19 }
   0x5   :  { %p405_p0 = scmp.ne.s32.totalorder %s29_s19, %s404_s20  ;;  %p410_p2 = scmp.lt.s32.totalorder %s404_s20, %s404_s20 }
   0x7   :  { %p411_p3 = por %p410_p2, %p409_p1 }
   0x9   :  { %p412_p4 = pnand %p411_p3, %p405_p0 }
   0xb   :  { %415 = shalt.err (!%p412_p4)
}
   0xc   :  { %s483_s21 = smov 128   ;;  %s484_s22 = smov 8  }
   0xd   :  { %34 = dma.hbm_to_vmem [thread:$0]  %s573_s1, 2048, %s29_s19, [#allocation6], %s483_s21, %s483_s21, %s484_s22  }
   0xe   :  { %s485_s25 = smov [#allocation2]   ;;  %s486_s27 = smov [#allocation7]  }
   0xf   :  { %s19_s26 = sshll.u32 %s485_s25, 4  ;;  %s42_s28 = sshll.u32 %s486_s27, 4  ;;  %s20_s26 = int_to_ptr.vmem [resolvable:$true] %s19_s26  ;;  %s43_s28 = int_to_ptr.vmem [resolvable:$true] %s42_s28 }
  0x10   :  { %s424_s29 = scalar_lea.vmem %s20_s26, 128  ;;  %p429_p6 = scmp.lt.s32.totalorder %s20_s26, %s20_s26 }
  0x11   :  { %p425_p5 = scmp.ne.s32.totalorder %s20_s26, %s424_s29  ;;  %p430_p7 = scmp.lt.s32.totalorder %s424_s29, %s424_s29 }
  0x13   :  { %p431_p8 = por %p430_p7, %p429_p6 }
  0x15   :  { %p432_p9 = pnand %p431_p8, %p425_p5 }
  0x17   :  { %435 = shalt.err (!%p432_p9)
}
  0x18   :  { %22 = dma.hbm_to_vmem [thread:$0]  %s572_s0, 128, %s20_s26, [#allocation3]  }
  0x19   :  { %s444_s7 = scalar_lea.vmem %s43_s28, 2048  ;;  %p449_p11 = scmp.lt.s32.totalorder %s43_s28, %s43_s28 }
  0x1a   :  { %p445_p10 = scmp.ne.s32.totalorder %s43_s28, %s444_s7  ;;  %p450_p12 = scmp.lt.s32.totalorder %s444_s7, %s444_s7 }
  0x1c   :  { %p451_p13 = por %p450_p12, %p449_p11 }
  0x1e   :  { %p452_p0 = pnand %p451_p13, %p445_p10 }
  0x20   :  { %455 = shalt.err (!%p452_p0)
}
  0x21   :  { %48 = dma.hbm_to_vmem [thread:$0]  %s575_s3, 2048, %s43_s28, [#allocation6], %s483_s21, %s483_s21, %s484_s22  }
  0x22   :  { %476 = dma.done.wait [#allocation3], 128  }
  0x23   :  { %477 = vsyncadd [#allocation3], 4294967168 }
  0x24   :  { %478 = dma.done.wait [#allocation6], 4096  }
  0x25   :  { %479 = vsyncadd [#allocation6], 4294963200  ;;  %v487_v0 = vmov 0.0   ;;  %vm488_vm0 = vmmov 0   ;;  %v88_v1 = vld [vmem:[#allocation5 + $0x78] sm:$0xff]  ;;  %v87_v2 = vld [vmem:[#allocation5 + $0x70] sm:$0xff] }
  0x26   :  { %316 = vmatprep.subr.mxu0 %v487_v0  ;;  %348 = vmatprep.mubr.msk.f32.mxu0 %vm488_vm0, %v487_v0  ;;  %v86_v3 = vld [vmem:[#allocation5 + $0x68] sm:$0xff]  ;;  %v85_v4 = vld [vmem:[#allocation5 + $0x60] sm:$0xff]  ;;  %v84_v5 = vld [vmem:[#allocation5 + $0x58] sm:$0xff]  ;;  %s489_s11 = smov [#allocation8]  }
  0x27   :  { %351 = vmatprep.subr.mxu1 %v487_v0  ;;  %383 = vmatprep.mubr.msk.f32.mxu1 %vm488_vm0, %v487_v0  ;;  %v83_v6 = vld [vmem:[#allocation5 + $0x50] sm:$0xff]  ;;  %v82_v7 = vld [vmem:[#allocation5 + $0x48] sm:$0xff]  ;;  %v81_v8 = vld [vmem:[#allocation5 + $0x40] sm:$0xff] }
  0x28   :  { %317 = vmatpush3.msra.mxu0 %v88_v1  ;;  %v80_v9 = vld [vmem:[#allocation5 + $0x38] sm:$0xff]  ;;  %v79_v10 = vld [vmem:[#allocation5 + $0x30] sm:$0xff]  ;;  %v78_v11 = vld [vmem:[#allocation5 + $0x28] sm:$0xff] }
  0x29   :  { %318 = vmatprep.subr.mxu0 %v487_v0  ;;  %v77_v12 = vld [vmem:[#allocation5 + $0x20] sm:$0xff]  ;;  %v76_v13 = vld [vmem:[#allocation5 + $0x18] sm:$0xff]  ;;  %v75_v14 = vld [vmem:[#allocation5 + $0x10] sm:$0xff] }
  0x2a   :  { %319 = vmatpush3.msra.mxu0 %v87_v2  ;;  %v74_v15 = vld [vmem:[#allocation5 + $0x8] sm:$0xff]  ;;  %v73_v16 = vld [vmem:[#allocation5] sm:$0xff]  ;;  %v72_v17 = vld [vmem:[#allocation2] sm:$0xff] }
  0x2b   :  { %320 = vmatprep.subr.mxu0 %v487_v0  ;;  %v191_v18 = vld [vmem:[#allocation7 + $0x78] sm:$0xff]  ;;  %v190_v19 = vld [vmem:[#allocation7 + $0x70] sm:$0xff]  ;;  %v189_v20 = vld [vmem:[#allocation7 + $0x68] sm:$0xff] }
  0x2c   :  { %321 = vmatpush3.msra.mxu0 %v86_v3  ;;  %352 = vmatpush3.msra.mxu1 %v191_v18  ;;  %v188_v21 = vld [vmem:[#allocation7 + $0x60] sm:$0xff]  ;;  %v187_v22 = vld [vmem:[#allocation7 + $0x58] sm:$0xff]  ;;  %v186_v23 = vld [vmem:[#allocation7 + $0x50] sm:$0xff] }
  0x2d   :  { %322 = vmatprep.subr.mxu0 %v487_v0  ;;  %353 = vmatprep.subr.mxu1 %v487_v0  ;;  %v185_v24 = vld [vmem:[#allocation7 + $0x48] sm:$0xff]  ;;  %v184_v25 = vld [vmem:[#allocation7 + $0x40] sm:$0xff]  ;;  %v183_v26 = vld [vmem:[#allocation7 + $0x38] sm:$0xff] }
  0x2e   :  { %323 = vmatpush3.msra.mxu0 %v85_v4  ;;  %354 = vmatpush3.msra.mxu1 %v190_v19  ;;  %v182_v27 = vld [vmem:[#allocation7 + $0x30] sm:$0xff]  ;;  %v181_v28 = vld [vmem:[#allocation7 + $0x28] sm:$0xff]  ;;  %v180_v29 = vld [vmem:[#allocation7 + $0x20] sm:$0xff] }
  0x2f   :  { %324 = vmatprep.subr.mxu0 %v487_v0  ;;  %355 = vmatprep.subr.mxu1 %v487_v0  ;;  %v179_v30 = vld [vmem:[#allocation7 + $0x18] sm:$0xff]  ;;  %v178_v31 = vld [vmem:[#allocation7 + $0x10] sm:$0xff]  ;;  %v177_v32 = vld [vmem:[#allocation7 + $0x8] sm:$0xff] }
  0x30   :  { %325 = vmatpush3.msra.mxu0 %v84_v5  ;;  %356 = vmatpush3.msra.mxu1 %v189_v20  ;;  %v176_v33 = vld [vmem:[#allocation7] sm:$0xff]  ;;  %v281_v34 = vld [vmem:[%s574_s2] ss:$0 sm:$0xff]  ;;  %s270_s2 = sshll.u32 %s489_s11, 4  ;;  %s271_s2 = int_to_ptr.vmem [resolvable:$true] %s270_s2 }
  0x31   :  { %326 = vmatprep.subr.mxu0 %v487_v0  ;;  %357 = vmatprep.subr.mxu1 %v487_v0  ;;  %v280_v47 = vld [vmem:[%s576_s4] ss:$0 sm:$0xff]  ;;  %s456_s12 = scalar_lea.vmem %s271_s2, 128  ;;  %p461_p2 = scmp.lt.s32.totalorder %s271_s2, %s271_s2 }
  0x32   :  { %327 = vmatpush3.msra.mxu0 %v83_v6  ;;  %358 = vmatpush3.msra.mxu1 %v188_v21  ;;  %p457_p1 = scmp.ne.s32.totalorder %s271_s2, %s456_s12  ;;  %p462_p3 = scmp.lt.s32.totalorder %s456_s12, %s456_s12 }
  0x33   :  { %328 = vmatprep.subr.mxu0 %v487_v0  ;;  %359 = vmatprep.subr.mxu1 %v487_v0 }
  0x34   :  { %329 = vmatpush3.msra.mxu0 %v82_v7  ;;  %360 = vmatpush3.msra.mxu1 %v187_v22  ;;  %p463_p4 = por %p462_p3, %p461_p2 }
  0x35   :  { %330 = vmatprep.subr.mxu0 %v487_v0  ;;  %361 = vmatprep.subr.mxu1 %v487_v0 }
  0x36   :  { %331 = vmatpush3.msra.mxu0 %v81_v8  ;;  %362 = vmatpush3.msra.mxu1 %v186_v23  ;;  %p464_p5 = pnand %p463_p4, %p457_p1 }
  0x37   :  { %332 = vmatprep.subr.mxu0 %v487_v0  ;;  %363 = vmatprep.subr.mxu1 %v487_v0 }
  0x38   :  { %333 = vmatpush3.msra.mxu0 %v80_v9  ;;  %364 = vmatpush3.msra.mxu1 %v185_v24 }
  0x39   :  { %334 = vmatprep.subr.mxu0 %v487_v0  ;;  %365 = vmatprep.subr.mxu1 %v487_v0 }
  0x3a   :  { %335 = vmatpush3.msra.mxu0 %v79_v10  ;;  %366 = vmatpush3.msra.mxu1 %v184_v25 }
  0x3b   :  { %336 = vmatprep.subr.mxu0 %v487_v0  ;;  %367 = vmatprep.subr.mxu1 %v487_v0 }
  0x3c   :  { %337 = vmatpush3.msra.mxu0 %v78_v11  ;;  %368 = vmatpush3.msra.mxu1 %v183_v26 }
  0x3d   :  { %338 = vmatprep.subr.mxu0 %v487_v0  ;;  %369 = vmatprep.subr.mxu1 %v487_v0 }
  0x3e   :  { %339 = vmatpush3.msra.mxu0 %v77_v12  ;;  %370 = vmatpush3.msra.mxu1 %v182_v27 }
  0x3f   :  { %340 = vmatprep.subr.mxu0 %v487_v0  ;;  %371 = vmatprep.subr.mxu1 %v487_v0 }
  0x40   :  { %341 = vmatpush3.msra.mxu0 %v76_v13  ;;  %372 = vmatpush3.msra.mxu1 %v181_v28 }
  0x41   :  { %342 = vmatprep.subr.mxu0 %v487_v0  ;;  %373 = vmatprep.subr.mxu1 %v487_v0 }
  0x42   :  { %343 = vmatpush3.msra.mxu0 %v75_v14  ;;  %374 = vmatpush3.msra.mxu1 %v180_v29 }
  0x43   :  { %344 = vmatprep.subr.mxu0 %v487_v0  ;;  %375 = vmatprep.subr.mxu1 %v487_v0 }
  0x44   :  { %345 = vmatpush3.msra.mxu0 %v74_v15  ;;  %376 = vmatpush3.msra.mxu1 %v179_v30 }
  0x45   :  { %346 = vmatprep.subr.mxu0 %v487_v0  ;;  %377 = vmatprep.subr.mxu1 %v487_v0 }
  0x46   :  { %347 = vmatpush3.msra.mxu0 %v73_v16  ;;  %378 = vmatpush3.msra.mxu1 %v178_v31 }
  0x47   :  { %349 = vmatmul.mubr.f32.vlgmr.msra.gmra.mxu0 %v72_v17  ;;  %379 = vmatprep.subr.mxu1 %v487_v0 }
  0x48   :  { %380 = vmatpush3.msra.mxu1 %v177_v32 }
  0x49   :  { %381 = vmatprep.subr.mxu1 %v487_v0 }
  0x4a   :  { %382 = vmatpush3.msra.mxu1 %v176_v33 }
 0x107   :  { %v162_v35 = vpop.f32.mrf.mxu0 }
 0x108   :  { %v163_v36 = vadd.f32 %v281_v34, %v162_v35 }
 0x109   :  { %v350_v37 = vpop.f32.mrf.mxu0 }
 0x10a   :  { %v167_v38 = vmul.f32 0.044715, %v163_v36  ;;  %v166_v44 = vmul.f32 0.5, %v163_v36 }
 0x10c   :  { %v168_v39 = vmul.f32 %v167_v38, %v163_v36 }
 0x10e   :  { %v169_v40 = vmul.f32 %v168_v39, %v163_v36 }
 0x110   :  { %v170_v41 = vadd.f32 %v169_v40, %v163_v36 }
 0x112   :  { %v171_v42 = vmul.f32 0.7978846, %v170_v41 }
 0x114   :  { %394 = vtanh.f32 %v171_v42 }
 0x121   :  { %v395_v43 = vpop.eup %394 }
 0x122   :  { %v173_v45 = vadd.f32 1.0, %v395_v43 }
 0x124   :  { %v174_v46 = vmul.f32 %v173_v45, %v166_v44 }
 0x126   :  { %384 = vmatmul.mubr.f32.vlgmr.msra.gmra.mxu1 %v174_v46 }
 0x1e6   :  { %v258_v48 = vpop.f32.mrf.mxu1 }
 0x1e7   :  { %v262_v49 = vadd.f32 %v280_v47, %v258_v48 }
 0x1e8   :  { %v385_v50 = vpop.f32.mrf.mxu1 }
 0x1e9   :  { %263 = vst [vmem:[#allocation8] sm:$0xff] %v262_v49 }
 0x1ea   :  { %467 = shalt.err (!%p464_p5)
}
 0x1eb   :  { %273 = dma.vmem_to_hbm [thread:$0]  %s271_s2, 128, %s577_s5, [#allocation4]  }
 0x1ec   :  { %480 = dma.done.wait [#allocation4], 128  }
 0x1ed   :  { %481 = vsyncadd [#allocation4], 4294967168 }
 0x1ee   :  { %277 = vsyncpa [#allocation3], 1 }
 0x1ef   :  { %278 = vsyncpa [#allocation6], 1 }
 0x1f0   :  { %279 = vsyncpa [#allocation4], 1 }

</bundles_post_ra>
